<compile_context>
chip_gen: v6e
topology: v6e:2x2x1
jax: 0.10.0
libtpu: 0.0.40
codegen_flags: <defaults>
</compile_context>

<pallas_src>
import functools

import numpy as np
import jax
import jax.numpy as jnp
from jax.experimental import pallas as pl
from jax.experimental.pallas import tpu as pltpu


def _round_up(x, m):
    return (x + m - 1) // m * m


def _vmem_limit_bytes():
    # ~85% of physical VMEM: ~109 MiB on v5e/v6e (128 MiB), ~54 MiB on v7x
    # (64 MiB), with headroom for Mosaic's internal scratch.
    try:
        cap = getattr(pltpu.get_tpu_info(), "vmem_capacity_bytes", None)
        if cap:
            return int(cap * 0.85)
    except Exception:
        pass
    return 64 * 1024 * 1024


# -----------------------------------------------------------------------------
# Fused Pallas kernel body.  Grid = (batch_tiles, n_layers).
# -----------------------------------------------------------------------------
def _wavenet_kernel(dil_ref, x_ref, wup_ref, bup_ref, wdil_ref, bdil_ref,
                    wsr_ref, bsr_ref, whead_ref, bhead_ref, o_ref,
                    skip_acc, hist, *,
                    b_tile, seq_len, out_len, d_hidden, d_out, d_head_pad,
                    kernel_size, pad_rows):
    l = pl.program_id(1)
    M = b_tile * seq_len
    H = d_hidden

    # The residual stream h lives in rows [pad_rows, pad_rows+M) of `hist`;
    # rows [0, pad_rows) are a causal zero pad so the dilated-tap reads below
    # never index out of bounds.  pad_rows >= max shift and is 8-aligned.

    # ---- first layer step: upscale linear + state init ----------------------
    @pl.when(l == 0)
    def _():
        hist[0:pad_rows, :] = jnp.zeros((pad_rows, H), jnp.float32)
        x = x_ref[...].astype(jnp.bfloat16)
        hist[pad_rows:pad_rows + M, :] = (
            jnp.dot(x, wup_ref[...], preferred_element_type=jnp.float32)
            + bup_ref[...])
        skip_acc[...] = jnp.zeros_like(skip_acc)

    # ---- dilated causal conv of layer `l` ------------------------------------
    dil = dil_ref[l]
    h_cur = hist[pad_rows:pad_rows + M, :]                 # (M, H) f32

    # Local (within-batch-element) position of every flattened row.  Rows with
    # pos < shift have no causal history -> forced to zero; this also stops
    # shifted rows leaking across batch boundaries in the flattened layout.
    pos = jax.lax.broadcasted_iota(jnp.int32, (M, 1), 0) % seq_len

    taps = []
    for j in range(kernel_size):
        if j == kernel_size - 1:                           # shift == 0 tap
            taps.append(h_cur.astype(jnp.bfloat16))
        else:
            shift = (kernel_size - 1 - j) * dil            # dynamic (per layer)
            t = hist[pl.ds(pad_rows - shift, M), :]        # row r <- h[r-shift]
            t = jnp.where(pos < shift, jnp.zeros_like(t), t)
            taps.append(t.astype(jnp.bfloat16))

    conv = jnp.zeros((M, 2 * H), jnp.float32) + bdil_ref[...]
    if H >= 128:
        # K = H already fills the MXU contraction dim; accumulate k per-tap
        # matmuls and skip the (M, k*H) concatenate copy.
        for j in range(kernel_size):
            conv = conv + jnp.dot(taps[j], wdil_ref[j * H:(j + 1) * H, :],
                                  preferred_element_type=jnp.float32)
    else:
        # Small H: stack taps along lanes for one wider-K matmul.
        conv = conv + jnp.dot(jnp.concatenate(taps, axis=1), wdil_ref[...],
                              preferred_element_type=jnp.float32)

    # Gated activation (f32 VPU/EUP), then 1x1 conv producing (residual||skip).
    z = jnp.tanh(conv[:, :H]) * jax.nn.sigmoid(conv[:, H:])
    sr = jnp.dot(z.astype(jnp.bfloat16), wsr_ref[...],
                 preferred_element_type=jnp.float32) + bsr_ref[...]
    hist[pad_rows:pad_rows + M, :] = h_cur + sr[:, :H]     # residual update
    skip_acc[...] = skip_acc[...] + sr[:, H:]

    # ---- last layer step: fused (loc || softplus(scale)) head + store -------
    @pl.when(l == pl.num_programs(1) - 1)
    def _():
        # Head matmul kept over all M rows (it is <= one layer's matmul cost);
        # only the surviving rows are written back (lane-dense 128-wide store).
        y = jnp.dot(skip_acc[...].astype(jnp.bfloat16), whead_ref[...],
                    preferred_element_type=jnp.float32) + bhead_ref[...]
        lane = jax.lax.broadcasted_iota(jnp.int32, (M, d_head_pad), 1)
        is_scale = (lane >= d_out) & (lane < 2 * d_out)
        y = jnp.where(is_scale, jax.nn.softplus(y) + 1e-6, y)
        for b in range(b_tile):
            src = b * seq_len + (seq_len - out_len)
            o_ref[b * out_len:(b + 1) * out_len, :] = y[src:src + out_len, :]


def pallas_wavenet_stack(x2d, wup, bup, wdil, bdil, wsr, bsr, whead, bhead, *,
                         dilations, d_out, batch, seq_len, out_len,
                         kernel_size, b_tile=None):
    BL, d_in = x2d.shape
    assert BL == batch * seq_len
    assert out_len <= seq_len
    H = wup.shape[1]
    d_head_pad = whead.shape[1]
    n_layers = wdil.shape[0]
    assert n_layers == len(dilations)

    if b_tile is None:
        # >= 2 grid steps on the "parallel" batch axis keeps both v7x
        # TensorCores busy; on 1-TC chips the extra step costs ~0.35 us.
        b_tile = batch // 2 if (batch % 2 == 0 and batch >= 2) else batch
    assert batch % b_tile == 0

    max_shift = (kernel_size - 1) * int(max(dilations)) if dilations else 0
    pad_rows = max(8, _round_up(max_shift, 8))
    M = b_tile * seq_len

    dil_arr = jnp.asarray([int(d) for d in dilations], jnp.int32)

    kern = functools.partial(
        _wavenet_kernel, b_tile=b_tile, seq_len=seq_len, out_len=out_len,
        d_hidden=H, d_out=d_out, d_head_pad=d_head_pad,
        kernel_size=kernel_size, pad_rows=pad_rows)

    # Advisory cost hint so XLA schedules neighbouring glue around this call.
    flops = (2 * BL * d_in * H
             + n_layers * 2 * BL * H * (2 * H) * (kernel_size + 1)
             + 2 * BL * H * d_head_pad)
    transcendentals = n_layers * 2 * BL * H + BL * d_head_pad
    bytes_accessed = sum(int(a.size) * a.dtype.itemsize for a in
                         (x2d, wup, bup, wdil, bdil, wsr, bsr, whead, bhead))
    bytes_accessed += batch * out_len * d_head_pad * 4
    cost = pl.CostEstimate(flops=int(flops),
                           transcendentals=int(transcendentals),
                           bytes_accessed=int(bytes_accessed))

    grid_spec = pltpu.PrefetchScalarGridSpec(
        num_scalar_prefetch=1,
        grid=(batch // b_tile, n_layers),
        in_specs=[
            pl.BlockSpec((M, d_in), lambda b, l, d: (b, 0)),            # x
            pl.BlockSpec((d_in, H), lambda b, l, d: (0, 0)),            # wup
            pl.BlockSpec((1, H), lambda b, l, d: (0, 0)),               # bup
            pl.BlockSpec((None, kernel_size * H, 2 * H),
                         lambda b, l, d: (l, 0, 0)),                    # wdil
            pl.BlockSpec((None, 1, 2 * H), lambda b, l, d: (l, 0, 0)),  # bdil
            pl.BlockSpec((None, H, 2 * H), lambda b, l, d: (l, 0, 0)),  # wsr
            pl.BlockSpec((None, 1, 2 * H), lambda b, l, d: (l, 0, 0)),  # bsr
            pl.BlockSpec((H, d_head_pad), lambda b, l, d: (0, 0)),      # whead
            pl.BlockSpec((1, d_head_pad), lambda b, l, d: (0, 0)),      # bhead
        ],
        out_specs=pl.BlockSpec((b_tile * out_len, d_head_pad),
                               lambda b, l, d: (b, 0)),
        scratch_shapes=[
            pltpu.VMEM((M, H), jnp.float32),               # skip accumulator
            pltpu.VMEM((pad_rows + M, H), jnp.float32),    # causal pad + h
        ],
    )

    return pl.pallas_call(
        kern,
        out_shape=jax.ShapeDtypeStruct((batch * out_len, d_head_pad),
                                       jnp.float32),
        grid_spec=grid_spec,
        compiler_params=pltpu.CompilerParams(
            dimension_semantics=("parallel", "arbitrary"),
            vmem_limit_bytes=_vmem_limit_bytes()),
        cost_estimate=cost,
    )(dil_arr, x2d, wup, bup, wdil, bdil, wsr, bsr, whead, bhead)


# -----------------------------------------------------------------------------
# Parameter init (deterministic, mirrors the PyTorch module's shapes)
# -----------------------------------------------------------------------------
def init_params(key, d_lag, d_cov, d_emb, d_output, d_hidden, N, kernel_size):
    keys = iter(jax.random.split(key, 8 + 4 * N + max(len(d_emb), 1)))

    def unif(k, shape, bound):
        return jax.random.uniform(k, shape, jnp.float32, -bound, bound)

    params = {}
    params["emb"] = [
        jax.random.normal(next(keys), (int(d_emb[i][0]), int(d_emb[i][1])),
                          jnp.float32)
        for i in range(len(d_emb))
    ]
    d_emb_tot = int(np.sum(d_emb[:, 1])) if len(d_emb) > 0 else 0
    d_in = d_lag + d_cov + d_emb_tot

    bu = 1.0 / np.sqrt(d_in)
    params["upscale"] = (unif(next(keys), (d_in, d_hidden), bu),
                         unif(next(keys), (d_hidden,), bu))

    cells = []
    for i in range(N):
        kd = 1.0 / np.sqrt(d_hidden * kernel_size)
        ks = 1.0 / np.sqrt(d_hidden * 1)
        cells.append(dict(
            wdil=unif(next(keys), (kernel_size, d_hidden, 2 * d_hidden), kd),
            bdil=unif(next(keys), (2 * d_hidden,), kd),
            wsr=unif(next(keys), (d_hidden, 2 * d_hidden), ks),
            bsr=unif(next(keys), (2 * d_hidden,), ks),
            dilation=2 ** i,
        ))
    params["cells"] = cells

    bo = 1.0 / np.sqrt(d_hidden)
    params["loc"] = (unif(next(keys), (d_hidden, d_output), bo),
                     unif(next(keys), (d_output,), bo))
    params["scale"] = (unif(next(keys), (d_hidden, d_output), bo),
                       unif(next(keys), (d_output,), bo))
    return params


# -----------------------------------------------------------------------------
# Forward pass (Pallas)
# -----------------------------------------------------------------------------
def wavenet_forward_pallas(params, X_emb, X_cov, X_lag, d_outputseqlen,
                           kernel_size, b_tile=None):
    dim_seq = X_lag.shape[0]
    # Embedding gathers + concat are host-side glue (plain JAX).
    x_embs = [params["emb"][i][X_emb[:, :, i]] for i in range(len(params["emb"]))]
    if x_embs:
        x_emb = jnp.concatenate(x_embs, axis=-1)
        h = jnp.concatenate([X_lag, X_cov[:dim_seq], x_emb[:dim_seq]], axis=-1)
    else:
        h = jnp.concatenate([X_lag, X_cov[:dim_seq]], axis=-1)

    x_blc = jnp.transpose(h, (1, 0, 2))                    # (B, L, Din)
    B, L, d_in = x_blc.shape
    x2d = x_blc.reshape(B * L, d_in)                       # wrapper-side fold

    W_up, b_up = params["upscale"]
    H = W_up.shape[1]
    cells = params["cells"]
    N = len(cells)
    d_out = params["loc"][0].shape[1]
    d_head_pad = max(128, _round_up(2 * d_out, 128))       # lane-dense output

    # Weight packing / bf16 casts (one-time, outside the kernel).
    wup = W_up.astype(jnp.bfloat16)
    bup = b_up.reshape(1, H)
    wdil = jnp.stack([c["wdil"].reshape(kernel_size * H, 2 * H)
                      for c in cells]).astype(jnp.bfloat16)      # (N, k*H, 2H)
    bdil = jnp.stack([c["bdil"] for c in cells]).reshape(N, 1, 2 * H)
    wsr = jnp.stack([c["wsr"] for c in cells]).astype(jnp.bfloat16)
    bsr = jnp.stack([c["bsr"] for c in cells]).reshape(N, 1, 2 * H)

    whead = jnp.zeros((H, d_head_pad), jnp.float32)
    whead = whead.at[:, :d_out].set(params["loc"][0])
    whead = whead.at[:, d_out:2 * d_out].set(params["scale"][0])
    whead = whead.astype(jnp.bfloat16)
    bhead = jnp.zeros((1, d_head_pad), jnp.float32)
    bhead = bhead.at[0, :d_out].set(params["loc"][1])
    bhead = bhead.at[0, d_out:2 * d_out].set(params["scale"][1])

    dilations = tuple(int(c["dilation"]) for c in cells)

    y = pallas_wavenet_stack(
        x2d, wup, bup, wdil, bdil, wsr, bsr, whead, bhead,
        dilations=dilations, d_out=d_out, batch=B, seq_len=L,
        out_len=d_outputseqlen, kernel_size=kernel_size, b_tile=b_tile)

    # (B*Lout, d_head_pad) -> (Lout, B, 2*d_out) -> (loc, scale)
    y = y.reshape(B, d_outputseqlen, d_head_pad)[:, :, :2 * d_out]
    y = jnp.transpose(y, (1, 0, 2))
    return y[..., :d_out], y[..., d_out:]


# -----------------------------------------------------------------------------
# Pure-JAX f32 reference (for correctness check)
# -----------------------------------------------------------------------------
def wavenet_forward_ref(params, X_emb, X_cov, X_lag, d_outputseqlen,
                        kernel_size):
    dim_seq = X_lag.shape[0]
    x_embs = [params["emb"][i][X_emb[:, :, i]] for i in range(len(params["emb"]))]
    if x_embs:
        x_emb = jnp.concatenate(x_embs, axis=-1)
        h = jnp.concatenate([X_lag, X_cov[:dim_seq], x_emb[:dim_seq]], axis=-1)
    else:
        h = jnp.concatenate([X_lag, X_cov[:dim_seq]], axis=-1)

    W_up, b_up = params["upscale"]
    h = h @ W_up + b_up                          # (L, B, H)
    h_b = jnp.transpose(h, (1, 0, 2))            # (B, L, H)
    H = h_b.shape[-1]
    L = h_b.shape[1]
    skip = jnp.zeros_like(h_b)
    for cell in params["cells"]:
        d = cell["dilation"]
        P = (kernel_size - 1) * d
        xp = jnp.pad(h_b, ((0, 0), (P, 0), (0, 0)))
        conv = jnp.zeros(h_b.shape[:2] + (2 * H,), jnp.float32) + cell["bdil"]
        for j in range(kernel_size):
            conv = conv + jnp.einsum("blc,cd->bld",
                                     xp[:, j * d:j * d + L, :], cell["wdil"][j])
        z = jnp.tanh(conv[..., :H]) * jax.nn.sigmoid(conv[..., H:])
        sr = jnp.einsum("blc,cd->bld", z, cell["wsr"]) + cell["bsr"]
        h_b = h_b + sr[..., :H]
        skip = skip + sr[..., H:]

    out = jnp.transpose(skip[:, -d_outputseqlen:, :], (1, 0, 2))
    Wl, bl = params["loc"]
    Ws, bs = params["scale"]
    return out @ Wl + bl, jax.nn.softplus(out @ Ws + bs) + 1e-6


# -----------------------------------------------------------------------------
if __name__ == "__main__":
    # N=5 -> dilations 1,2,4,8,16 (exercises shift >= 8 and shift >= seq_len).
    d_lag, d_cov, d_output, d_hidden, N, kernel_size = 4, 3, 2, 32, 5, 2
    d_emb = np.array([[5, 3], [7, 2]])           # (num_emb, 2): (vocab, dim)
    seq, seq_total, batch, d_outputseqlen = 16, 20, 2, 8

    root = jax.random.PRNGKey(0)
    kp, k1, k2, k3 = jax.random.split(root, 4)
    params = init_params(kp, d_lag, d_cov, d_emb, d_output, d_hidden, N,
                         kernel_size)

    X_lag = jax.random.normal(k1, (seq, batch, d_lag), jnp.float32)
    X_cov = jax.random.normal(k2, (seq_total, batch, d_cov), jnp.float32)
    X_emb = jax.random.randint(k3, (seq_total, batch, len(d_emb)), 0, 5,
                               jnp.int32)

    loc_r, scale_r = wavenet_forward_ref(params, X_emb, X_cov, X_lag,
                                         d_outputseqlen, kernel_size)

    # Default b_tile (= B//2 = 1): batch grid axis > 1 (megacore-friendly).
    loc, scale = wavenet_forward_pallas(params, X_emb, X_cov, X_lag,
                                        d_outputseqlen, kernel_size)
    loc = jax.block_until_ready(loc)
    scale = jax.block_until_ready(scale)
    assert loc.shape == (d_outputseqlen, batch, d_output)
    assert scale.shape == (d_outputseqlen, batch, d_output)
    # Tolerance reflects the bf16-MXU / f32-accumulate path vs f32 reference.
    np.testing.assert_allclose(np.asarray(loc), np.asarray(loc_r),
                               rtol=5e-2, atol=5e-2)
    np.testing.assert_allclose(np.asarray(scale), np.asarray(scale_r),
                               rtol=5e-2, atol=5e-2)

    # b_tile = B: both batch elements flattened into one block, which
    # exercises the cross-batch masking of the shifted taps.
    loc2, scale2 = wavenet_forward_pallas(params, X_emb, X_cov, X_lag,
                                          d_outputseqlen, kernel_size,
                                          b_tile=batch)
    loc2 = jax.block_until_ready(loc2)
    scale2 = jax.block_until_ready(scale2)
    np.testing.assert_allclose(np.asarray(loc2), np.asarray(loc_r),
                               rtol=5e-2, atol=5e-2)
    np.testing.assert_allclose(np.asarray(scale2), np.asarray(scale_r),
                               rtol=5e-2, atol=5e-2)

    print("KERNEL_OK")
</pallas_src>

<mosaic_0001>
module attributes {stable_mosaic.version = 11 : i64} {
  func.func @_wavenet_kernel(%arg0: i32, %arg1: i32, %arg2: memref<5xi32, #tpu.memory_space<smem>>, %arg3: memref<16x12xf32, #tpu.memory_space<vmem>>, %arg4: memref<12x32xbf16, #tpu.memory_space<vmem>>, %arg5: memref<1x32xf32, #tpu.memory_space<vmem>>, %arg6: memref<1x64x64xbf16, #tpu.memory_space<vmem>>, %arg7: memref<1x1x64xf32, #tpu.memory_space<vmem>>, %arg8: memref<1x32x64xbf16, #tpu.memory_space<vmem>>, %arg9: memref<1x1x64xf32, #tpu.memory_space<vmem>>, %arg10: memref<32x128xbf16, #tpu.memory_space<vmem>>, %arg11: memref<1x128xf32, #tpu.memory_space<vmem>>, %arg12: memref<8x128xf32, #tpu.memory_space<vmem>>, %arg13: memref<16x32xf32, #tpu.memory_space<vmem>>, %arg14: memref<32x32xf32, #tpu.memory_space<vmem>>) attributes {dimension_semantics = [#tpu.dimension_semantics<parallel>, #tpu.dimension_semantics<arbitrary>], iteration_bounds = array<i64: 2, 5>, scalar_prefetch = 1 : i64, scratch_operands = 2 : i64, tpu.core_type = #tpu.core_type<tc>, window_params = [{transform_indices = @transform_0, window_bounds = array<i64: 16, 12>}, {pipeline_mode = #tpu.pipeline_mode<synchronous>, transform_indices = @transform_1, window_bounds = array<i64: 12, 32>}, {pipeline_mode = #tpu.pipeline_mode<synchronous>, transform_indices = @transform_2, window_bounds = array<i64: 1, 32>}, {transform_indices = @transform_3, window_bounds = array<i64: 1, 64, 64>}, {transform_indices = @transform_4, window_bounds = array<i64: 1, 1, 64>}, {transform_indices = @transform_5, window_bounds = array<i64: 1, 32, 64>}, {transform_indices = @transform_6, window_bounds = array<i64: 1, 1, 64>}, {pipeline_mode = #tpu.pipeline_mode<synchronous>, transform_indices = @transform_7, window_bounds = array<i64: 32, 128>}, {pipeline_mode = #tpu.pipeline_mode<synchronous>, transform_indices = @transform_8, window_bounds = array<i64: 1, 128>}, {transform_indices = @transform_9, window_bounds = array<i64: 8, 128>}]} {
    %c0_i32 = arith.constant 0 : i32
    %0 = arith.cmpi eq, %arg1, %c0_i32 : i32
    %1 = arith.extui %0 : i1 to i32
    %c0_i32_0 = arith.constant 0 : i32
    %2 = arith.cmpi ne, %1, %c0_i32_0 : i32
    scf.if %2 {
      %cst_31 = arith.constant 0.000000e+00 : f32
      %72 = vector.broadcast %cst_31 : f32 to vector<16x32xf32>
      %c0_32 = arith.constant 0 : index
      %c0_33 = arith.constant 0 : index
      %73 = vector.load %arg14[%c0_32, %c0_33] : memref<32x32xf32, #tpu.memory_space<vmem>>, vector<16x32xf32>
      tpu.vector_store %arg14[%c0_32, %c0_33], %72 {strides = array<i32>} : memref<32x32xf32, #tpu.memory_space<vmem>>, vector<16x32xf32>,
      %c0_34 = arith.constant 0 : index
      %c0_35 = arith.constant 0 : index
      %74 = vector.load %arg3[%c0_34, %c0_35] : memref<16x12xf32, #tpu.memory_space<vmem>>, vector<16x12xf32>
      %75 = arith.truncf %74 : vector<16x12xf32> to vector<16x12xbf16>
      %c0_36 = arith.constant 0 : index
      %c0_37 = arith.constant 0 : index
      %76 = vector.load %arg4[%c0_36, %c0_37] : memref<12x32xbf16, #tpu.memory_space<vmem>>, vector<12x32xbf16>
      %cst_38 = arith.constant dense<0.000000e+00> : vector<16x32xf32>
      %77 = tpu.matmul %75, %76, %cst_38 {dimension_numbers = #tpu.dot_dimension_numbers<[1], [0], [0], [1], [0, 0, 1, 1], [], []>} : vector<16x12xbf16>, vector<12x32xbf16>, vector<16x32xf32> -> vector<16x32xf32>
      %c0_39 = arith.constant 0 : index
      %c0_40 = arith.constant 0 : index
      %78 = vector.load %arg5[%c0_39, %c0_40] : memref<1x32xf32, #tpu.memory_space<vmem>>, vector<1x32xf32>
      %79 = vector.broadcast %78 : vector<1x32xf32> to vector<16x32xf32>
      %80 = arith.addf %77, %79 : vector<16x32xf32>
      %c16_41 = arith.constant 16 : index
      %c0_42 = arith.constant 0 : index
      %81 = vector.load %arg14[%c16_41, %c0_42] : memref<32x32xf32, #tpu.memory_space<vmem>>, vector<16x32xf32>
      tpu.vector_store %arg14[%c16_41, %c0_42], %80 {strides = array<i32>} : memref<32x32xf32, #tpu.memory_space<vmem>>, vector<16x32xf32>,
      %cst_43 = arith.constant 0.000000e+00 : f32
      %82 = vector.broadcast %cst_43 : f32 to vector<16x32xf32>
      %c0_44 = arith.constant 0 : index
      %c0_45 = arith.constant 0 : index
      %83 = vector.load %arg13[%c0_44, %c0_45] : memref<16x32xf32, #tpu.memory_space<vmem>>, vector<16x32xf32>
      tpu.vector_store %arg13[%c0_44, %c0_45], %82 {strides = array<i32>} : memref<16x32xf32, #tpu.memory_space<vmem>>, vector<16x32xf32>,
    } else {
    }
    %3 = arith.index_cast %arg1 : i32 to index
    %4 = memref.load %arg2[%3] : memref<5xi32, #tpu.memory_space<smem>>
    %c16 = arith.constant 16 : index
    %c0 = arith.constant 0 : index
    %5 = vector.load %arg14[%c16, %c0] : memref<32x32xf32, #tpu.memory_space<vmem>>, vector<16x32xf32>
    %6 = tpu.iota {dimensions = array<i32: 0>} : vector<16x1xi32>
    %c16_i32 = arith.constant 16 : i32
    %c0_i32_1 = arith.constant 0 : i32
    %7 = arith.cmpi eq, %c16_i32, %c0_i32_1 : i32
    %c1_i32 = arith.constant 1 : i32
    %8 = arith.select %7, %c1_i32, %c16_i32 : i32
    %9 = vector.broadcast %8 : i32 to vector<16x1xi32>
    %10 = arith.remsi %6, %9 : vector<16x1xi32>
    %c0_i32_2 = arith.constant 0 : i32
    %11 = vector.broadcast %c0_i32_2 : i32 to vector<16x1xi32>
    %12 = arith.cmpi ne, %10, %11 : vector<16x1xi32>
    %c0_i32_3 = arith.constant 0 : i32
    %13 = vector.broadcast %c0_i32_3 : i32 to vector<16x1xi32>
    %14 = arith.cmpi slt, %10, %13 : vector<16x1xi32>
    %c0_i32_4 = arith.constant 0 : i32
    %15 = arith.cmpi slt, %8, %c0_i32_4 : i32
    %16 = vector.broadcast %15 : i1 to vector<16x1xi1>
    %17 = vector.broadcast %16 : vector<16x1xi1> to vector<16x1xi1>
    %18 = arith.xori %14, %17 : vector<16x1xi1>
    %19 = arith.andi %18, %12 : vector<16x1xi1>
    %20 = vector.broadcast %8 : i32 to vector<16x1xi32>
    %21 = arith.addi %10, %20 : vector<16x1xi32>
    %22 = arith.select %19, %21, %10 : vector<16x1xi1>, vector<16x1xi32>
    %c1_i32_5 = arith.constant 1 : i32
    %23 = arith.muli %c1_i32_5, %4 : i32
    %c16_i32_6 = arith.constant 16 : i32
    %24 = arith.subi %c16_i32_6, %23 : i32
    %25 = arith.index_cast %24 : i32 to index
    %c0_7 = arith.constant 0 : index
    %26 = vector.load %arg14[%25, %c0_7] : memref<32x32xf32, #tpu.memory_space<vmem>>, vector<16x32xf32>
    %27 = vector.broadcast %23 : i32 to vector<16x1xi32>
    %28 = arith.cmpi slt, %22, %27 : vector<16x1xi32>
    %cst = arith.constant 0.000000e+00 : f32
    %29 = vector.broadcast %cst : f32 to vector<16x32xf32>
    %30 = vector.shape_cast %28 : vector<16x1xi1> to vector<16x1xi1>
    %31 = vector.broadcast %30 : vector<16x1xi1> to vector<16x32xi1>
    %32 = arith.select %31, %29, %26 : vector<16x32xi1>, vector<16x32xf32>
    %33 = arith.truncf %32 : vector<16x32xf32> to vector<16x32xbf16>
    %34 = arith.truncf %5 : vector<16x32xf32> to vector<16x32xbf16>
    %cst_8 = arith.constant 0.000000e+00 : f32
    %35 = vector.broadcast %cst_8 : f32 to vector<16x64xf32>
    %c0_9 = arith.constant 0 : index
    %c0_10 = arith.constant 0 : index
    %c0_11 = arith.constant 0 : index
    %36 = vector.load %arg7[%c0_9, %c0_10, %c0_11] : memref<1x1x64xf32, #tpu.memory_space<vmem>>, vector<1x1x64xf32>
    %37 = vector.shape_cast %36 : vector<1x1x64xf32> to vector<1x64xf32>
    %38 = vector.broadcast %37 : vector<1x64xf32> to vector<16x64xf32>
    %39 = arith.addf %35, %38 : vector<16x64xf32>
    %40 = tpu.concatenate %33, %34 in 1 : vector<16x32xbf16>, vector<16x32xbf16> -> vector<16x64xbf16>
    %c0_12 = arith.constant 0 : index
    %c0_13 = arith.constant 0 : index
    %c0_14 = arith.constant 0 : index
    %41 = vector.load %arg6[%c0_12, %c0_13, %c0_14] : memref<1x64x64xbf16, #tpu.memory_space<vmem>>, vector<1x64x64xbf16>
    %42 = vector.shape_cast %41 : vector<1x64x64xbf16> to vector<64x64xbf16>
    %cst_15 = arith.constant dense<0.000000e+00> : vector<16x64xf32>
    %43 = tpu.matmul %40, %42, %cst_15 {dimension_numbers = #tpu.dot_dimension_numbers<[1], [0], [0], [1], [0, 0, 1, 1], [], []>} : vector<16x64xbf16>, vector<64x64xbf16>, vector<16x64xf32> -> vector<16x64xf32>
    %44 = arith.addf %39, %43 : vector<16x64xf32>
    %45 = vector.extract_strided_slice %44 {offsets = [0, 0], sizes = [16, 32], strides = [1, 1]} : vector<16x64xf32> to vector<16x32xf32>
    %46 = math.tanh %45 : vector<16x32xf32>
    %47 = vector.extract_strided_slice %44 {offsets = [0, 32], sizes = [16, 32], strides = [1, 1]} : vector<16x64xf32> to vector<16x32xf32>
    %48 = arith.negf %47 : vector<16x32xf32>
    %49 = math.exp %48 : vector<16x32xf32>
    %cst_16 = arith.constant 1.000000e+00 : f32
    %50 = vector.broadcast %cst_16 : f32 to vector<16x32xf32>
    %51 = arith.addf %50, %49 : vector<16x32xf32>
    %52 = arith.divf %50, %51 : vector<16x32xf32>
    %53 = arith.mulf %46, %52 : vector<16x32xf32>
    %54 = arith.truncf %53 : vector<16x32xf32> to vector<16x32xbf16>
    %c0_17 = arith.constant 0 : index
    %c0_18 = arith.constant 0 : index
    %c0_19 = arith.constant 0 : index
    %55 = vector.load %arg8[%c0_17, %c0_18, %c0_19] : memref<1x32x64xbf16, #tpu.memory_space<vmem>>, vector<1x32x64xbf16>
    %56 = vector.shape_cast %55 : vector<1x32x64xbf16> to vector<32x64xbf16>
    %cst_20 = arith.constant dense<0.000000e+00> : vector<16x64xf32>
    %57 = tpu.matmul %54, %56, %cst_20 {dimension_numbers = #tpu.dot_dimension_numbers<[1], [0], [0], [1], [0, 0, 1, 1], [], []>} : vector<16x32xbf16>, vector<32x64xbf16>, vector<16x64xf32> -> vector<16x64xf32>
    %c0_21 = arith.constant 0 : index
    %c0_22 = arith.constant 0 : index
    %c0_23 = arith.constant 0 : index
    %58 = vector.load %arg9[%c0_21, %c0_22, %c0_23] : memref<1x1x64xf32, #tpu.memory_space<vmem>>, vector<1x1x64xf32>
    %59 = vector.shape_cast %58 : vector<1x1x64xf32> to vector<1x64xf32>
    %60 = vector.broadcast %59 : vector<1x64xf32> to vector<16x64xf32>
    %61 = arith.addf %57, %60 : vector<16x64xf32>
    %62 = vector.extract_strided_slice %61 {offsets = [0, 0], sizes = [16, 32], strides = [1, 1]} : vector<16x64xf32> to vector<16x32xf32>
    %63 = arith.addf %5, %62 : vector<16x32xf32>
    %c16_24 = arith.constant 16 : index
    %c0_25 = arith.constant 0 : index
    %64 = vector.load %arg14[%c16_24, %c0_25] : memref<32x32xf32, #tpu.memory_space<vmem>>, vector<16x32xf32>
    tpu.vector_store %arg14[%c16_24, %c0_25], %63 {strides = array<i32>} : memref<32x32xf32, #tpu.memory_space<vmem>>, vector<16x32xf32>,
    %c0_26 = arith.constant 0 : index
    %c0_27 = arith.constant 0 : index
    %65 = vector.load %arg13[%c0_26, %c0_27] : memref<16x32xf32, #tpu.memory_space<vmem>>, vector<16x32xf32>
    %66 = vector.extract_strided_slice %61 {offsets = [0, 32], sizes = [16, 32], strides = [1, 1]} : vector<16x64xf32> to vector<16x32xf32>
    %67 = arith.addf %65, %66 : vector<16x32xf32>
    %c0_28 = arith.constant 0 : index
    %c0_29 = arith.constant 0 : index
    %68 = vector.load %arg13[%c0_28, %c0_29] : memref<16x32xf32, #tpu.memory_space<vmem>>, vector<16x32xf32>
    tpu.vector_store %arg13[%c0_28, %c0_29], %67 {strides = array<i32>} : memref<16x32xf32, #tpu.memory_space<vmem>>, vector<16x32xf32>,
    %c4_i32 = arith.constant 4 : i32
    %69 = arith.cmpi eq, %arg1, %c4_i32 : i32
    %70 = arith.extui %69 : i1 to i32
    %c0_i32_30 = arith.constant 0 : i32
    %71 = arith.cmpi ne, %70, %c0_i32_30 : i32
    scf.if %71 {
      %c0_31 = arith.constant 0 : index
      %c0_32 = arith.constant 0 : index
      %72 = vector.load %arg13[%c0_31, %c0_32] : memref<16x32xf32, #tpu.memory_space<vmem>>, vector<16x32xf32>
      %73 = arith.truncf %72 : vector<16x32xf32> to vector<16x32xbf16>
      %c0_33 = arith.constant 0 : index
      %c0_34 = arith.constant 0 : index
      %74 = vector.load %arg10[%c0_33, %c0_34] : memref<32x128xbf16, #tpu.memory_space<vmem>>, vector<32x128xbf16>
      %cst_35 = arith.constant dense<0.000000e+00> : vector<16x128xf32>
      %75 = tpu.matmul %73, %74, %cst_35 {dimension_numbers = #tpu.dot_dimension_numbers<[1], [0], [0], [1], [0, 0, 1, 1], [], []>} : vector<16x32xbf16>, vector<32x128xbf16>, vector<16x128xf32> -> vector<16x128xf32>
      %c0_36 = arith.constant 0 : index
      %c0_37 = arith.constant 0 : index
      %76 = vector.load %arg11[%c0_36, %c0_37] : memref<1x128xf32, #tpu.memory_space<vmem>>, vector<1x128xf32>
      %77 = vector.broadcast %76 : vector<1x128xf32> to vector<16x128xf32>
      %78 = arith.addf %75, %77 : vector<16x128xf32>
      %79 = tpu.iota {dimensions = array<i32: 1>} : vector<16x128xi32>
      %c2_i32 = arith.constant 2 : i32
      %80 = vector.broadcast %c2_i32 : i32 to vector<16x128xi32>
      %81 = arith.cmpi sge, %79, %80 : vector<16x128xi32>
      %c4_i32_38 = arith.constant 4 : i32
      %82 = vector.broadcast %c4_i32_38 : i32 to vector<16x128xi32>
      %83 = arith.cmpi slt, %79, %82 : vector<16x128xi32>
      %84 = arith.andi %81, %83 : vector<16x128xi1>
      %cst_39 = arith.constant 0.000000e+00 : f32
      %85 = vector.broadcast %cst_39 : f32 to vector<16x128xf32>
      %86 = arith.maximumf %78, %85 : vector<16x128xf32>
      %87 = vector.broadcast %cst_39 : f32 to vector<16x128xf32>
      %88 = arith.subf %78, %87 : vector<16x128xf32>
      %89 = arith.cmpf one, %88, %88 : vector<16x128xf32>
      %90 = vector.broadcast %cst_39 : f32 to vector<16x128xf32>
      %91 = arith.addf %78, %90 : vector<16x128xf32>
      %92 = math.absf %88 : vector<16x128xf32>
      %cst_40 = arith.constant 0.000000e+00 : f32
      %93 = vector.broadcast %cst_40 : f32 to vector<16x128xf32>
      %94 = arith.subf %93, %92 : vector<16x128xf32>
      %95 = math.exp %94 : vector<16x128xf32>
      %96 = math.log1p %95 : vector<16x128xf32>
      %97 = arith.addf %86, %96 : vector<16x128xf32>
      %98 = arith.select %89, %91, %97 : vector<16x128xi1>, vector<16x128xf32>
      %cst_41 = arith.constant 9.99999997E-7 : f32
      %99 = vector.broadcast %cst_41 : f32 to vector<16x128xf32>
      %100 = arith.addf %98, %99 : vector<16x128xf32>
      %101 = arith.select %84, %100, %78 : vector<16x128xi1>, vector<16x128xf32>
      %102 = vector.extract_strided_slice %101 {offsets = [8, 0], sizes = [8, 128], strides = [1, 1]} : vector<16x128xf32> to vector<8x128xf32>
      %c0_42 = arith.constant 0 : index
      %c0_43 = arith.constant 0 : index
      %103 = vector.load %arg12[%c0_42, %c0_43] : memref<8x128xf32, #tpu.memory_space<vmem>>, vector<8x128xf32>
      tpu.vector_store %arg12[%c0_42, %c0_43], %102 {strides = array<i32>} : memref<8x128xf32, #tpu.memory_space<vmem>>, vector<8x128xf32>,
    } else {
    }
    return
  }
  func.func @transform_0(%arg0: i32, %arg1: i32, %arg2: memref<5xi32, #tpu.memory_space<smem>>) -> (i32, i32) {
    %c0_i32 = arith.constant 0 : i32
    %c0_i32_0 = arith.constant 0 : i32
    return %arg0, %c0_i32 : i32, i32
  }
  func.func @transform_1(%arg0: i32, %arg1: i32, %arg2: memref<5xi32, #tpu.memory_space<smem>>) -> (i32, i32) {
    %c0_i32 = arith.constant 0 : i32
    %c0_i32_0 = arith.constant 0 : i32
    %c0_i32_1 = arith.constant 0 : i32
    return %c0_i32, %c0_i32_0 : i32, i32
  }
  func.func @transform_2(%arg0: i32, %arg1: i32, %arg2: memref<5xi32, #tpu.memory_space<smem>>) -> (i32, i32) {
    %c0_i32 = arith.constant 0 : i32
    %c0_i32_0 = arith.constant 0 : i32
    %c0_i32_1 = arith.constant 0 : i32
    return %c0_i32, %c0_i32_0 : i32, i32
  }
  func.func @transform_3(%arg0: i32, %arg1: i32, %arg2: memref<5xi32, #tpu.memory_space<smem>>) -> (i32, i32, i32) {
    %c0_i32 = arith.constant 0 : i32
    %c0_i32_0 = arith.constant 0 : i32
    %c0_i32_1 = arith.constant 0 : i32
    return %arg1, %c0_i32, %c0_i32_0 : i32, i32, i32
  }
  func.func @transform_4(%arg0: i32, %arg1: i32, %arg2: memref<5xi32, #tpu.memory_space<smem>>) -> (i32, i32, i32) {
    %c0_i32 = arith.constant 0 : i32
    %c0_i32_0 = arith.constant 0 : i32
    %c0_i32_1 = arith.constant 0 : i32
    return %arg1, %c0_i32, %c0_i32_0 : i32, i32, i32
  }
  func.func @transform_5(%arg0: i32, %arg1: i32, %arg2: memref<5xi32, #tpu.memory_space<smem>>) -> (i32, i32, i32) {
    %c0_i32 = arith.constant 0 : i32
    %c0_i32_0 = arith.constant 0 : i32
    %c0_i32_1 = arith.constant 0 : i32
    return %arg1, %c0_i32, %c0_i32_0 : i32, i32, i32
  }
  func.func @transform_6(%arg0: i32, %arg1: i32, %arg2: memref<5xi32, #tpu.memory_space<smem>>) -> (i32, i32, i32) {
    %c0_i32 = arith.constant 0 : i32
    %c0_i32_0 = arith.constant 0 : i32
    %c0_i32_1 = arith.constant 0 : i32
    return %arg1, %c0_i32, %c0_i32_0 : i32, i32, i32
  }
  func.func @transform_7(%arg0: i32, %arg1: i32, %arg2: memref<5xi32, #tpu.memory_space<smem>>) -> (i32, i32) {
    %c0_i32 = arith.constant 0 : i32
    %c0_i32_0 = arith.constant 0 : i32
    %c0_i32_1 = arith.constant 0 : i32
    return %c0_i32, %c0_i32_0 : i32, i32
  }
  func.func @transform_8(%arg0: i32, %arg1: i32, %arg2: memref<5xi32, #tpu.memory_space<smem>>) -> (i32, i32) {
    %c0_i32 = arith.constant 0 : i32
    %c0_i32_0 = arith.constant 0 : i32
    %c0_i32_1 = arith.constant 0 : i32
    return %c0_i32, %c0_i32_0 : i32, i32
  }
  func.func @transform_9(%arg0: i32, %arg1: i32, %arg2: memref<5xi32, #tpu.memory_space<smem>>) -> (i32, i32) {
    %c0_i32 = arith.constant 0 : i32
    %c0_i32_0 = arith.constant 0 : i32
    return %arg0, %c0_i32 : i32, i32
  }
}

</mosaic_0001>

<bundles_post_ra>
// kernel: tpu_custom_call.1
= control target key start
LH: loop header
LB: loop body
LE: loop exit
PB: predicated region body
PF: predicated region fallthrough
CT: control target
= control target key end

     0   :  { %s1832_s0 = inlined_call_operand.vmem [shape: s32[5], index: 0, kind: input, shape index: {}]   ;;  %s1833_s1 = inlined_call_operand.vmem [shape: f32[32,12], index: 1, kind: input, shape index: {}]   ;;  %s1834_s2 = inlined_call_operand.vmem [shape: bf16[12,32], index: 2, kind: input, shape index: {}]   ;;  %s1835_s3 = inlined_call_operand.vmem [shape: f32[1,32], index: 3, kind: input, shape index: {}]   ;;  %s1836_s4 = inlined_call_operand.hbm [shape: bf16[5,64,64], index: 4, kind: input, shape index: {}]   ;;  %s1837_s5 = inlined_call_operand.vmem [shape: f32[5,1,64], index: 5, kind: input, shape index: {}]   ;;  %s1838_s6 = inlined_call_operand.hbm [shape: bf16[5,32,64], index: 6, kind: input, shape index: {}]   ;;  %s1839_s7 = inlined_call_operand.vmem [shape: f32[5,1,64], index: 7, kind: input, shape index: {}]   ;;  %s1840_s8 = inlined_call_operand.vmem [shape: bf16[32,128], index: 8, kind: input, shape index: {}]   ;;  %s1841_s9 = inlined_call_operand.vmem [shape: f32[1,128], index: 9, kind: input, shape index: {}]   ;;  %s1842_s10 = inlined_call_operand.hbm [shape: f32[16,128], index: 10, kind: output, shape index: {}]  }
   0x1   :  { %1853 = sst [smem:[#allocation26_spill]] %s1836_s4  ;;  %s15_s15 = sshll.u32 %s1832_s0, 4  ;;  %s16_s15 = int_to_ptr.vmem [resolvable:$true] %s15_s15 }
   0x2   :  { %1854 = sst [smem:[#allocation27_spill]] %s1841_s9  ;;  %s1267_s16 = scalar_lea.vmem %s16_s15, 16 }
   0x3   :  { %1855 = sst [smem:[#allocation28_spill]] %s1842_s10  ;;  %p1268_p0 = scmp.ne.s32.totalorder %s16_s15, %s1267_s16 }
   0x4   :  { %p1272_p1 = scmp.lt.s32.totalorder %s16_s15, %s16_s15  ;;  %p1273_p2 = scmp.lt.s32.totalorder %s1267_s16, %s1267_s16 }
   0x6   :  { %p1274_p3 = por %p1273_p2, %p1272_p1 }
   0x8   :  { %p1275_p4 = pnand %p1274_p3, %p1268_p0 }
   0xa   :  { %1278 = shalt.err (!%p1275_p4)  }
   0xb   :  { %s1463_s17 = smov [#allocation5]  }
   0xc   :  { %18 = dma.vmem_to_smem %s16_s15, 16, %s1463_s17, [#allocation4] }
   0xd   :  { %1405 = dma.done.wait [#allocation4], 16 }
   0xe   :  { %1406 = vsyncadd [#allocation4], 4294967280 }
   0xf   :  { %20 = sfence }
  0x10   :  { %21 = vsyncpa [#allocation7], 0 }
  0x11   :  { %23 = vsyncpa [#allocation7 + $0x1], 0 }
  0x12   :  { %24 = vsyncpa [#allocation10], 0 }
  0x13   :  { %26 = vsyncpa [#allocation10 + $0x1], 0 }
  0x14   :  { %27 = vsyncpa [#allocation8], 0 }
  0x15   :  { %29 = vsyncpa [#allocation8 + $0x1], 0  ;;  %s1535_s0 = smov 0   ;;  %s1537_s18 = smov 0  }
  0x16   :  { %s1539_s19 = smov 0   ;;  %s1541_s20 = smov 0  }
  0x17   :  { %s1543_s21 = smov 0   ;;  %s1545_s22 = smov 0  }
  0x18   :  { %s1547_s23 = smov 0   ;;  %s1549_s24 = smov 0  }
  0x19   :  { %s1551_s25 = smov 0   ;;  %s1553_s26 = smov 0  }
  0x1a   :  { %s1555_s27 = smov 0  }
  0x1b LB: > { %1856 = sst [smem:[#allocation16_spill]] %s1421_s0  ;;  %s1034_s28 = sadd.s32 4294967295, %s1461_s27   ;;  %s1461_s27 = sphi %s1555_s27, %s35_s27   ;;  %s1457_s26 = sphi %s1553_s26, %s1884_s26   ;;  %s1453_s25 = sphi %s1551_s25, %s1891_s25   ;;  %s1449_s24 = sphi %s1549_s24, %s1882_s24   ;;  %s1445_s23 = sphi %s1547_s23, %s1890_s23   ;;  %s1441_s22 = sphi %s1545_s22, %s1889_s22   ;;  %s1437_s21 = sphi %s1543_s21, %s1888_s21   ;;  %s1433_s20 = sphi %s1541_s20, %s1887_s20   ;;  %s1429_s19 = sphi %s1539_s19, %s1879_s19   ;;  %s1425_s18 = sphi %s1537_s18, %s1886_s18   ;;  %s1421_s0 = sphi %s1535_s0, %s1885_s0  }
  0x1c   : > { %1857 = sst [smem:[#allocation17_spill]] %s1429_s19  ;;  %s1035_s29 = sadd.s32 4294967294, %s1461_s27  }
  0x1d   : > { %1858 = sst [smem:[#allocation18_spill]] %s1441_s22  ;;  %s44_s30 = sadd.s32 1, %s1453_s25 }
  0x1e   : > { %1859 = sst [smem:[#allocation19_spill]] %s1457_s26  ;;  %s47_s11 = sadd.s32 1, %s1457_s26 }
  0x1f   : > { %p45_p5 = scmp.ge.s32.totalorder %s44_s30, 5  ;;  %s122_s12 = sadd.s32 1, %s1441_s22 }
  0x20   : > { %p129_p6 = scmp.ne.s32.totalorder %s1441_s22, %s1437_s21  ;;  %p130_p7 = scmp.eq.s32.totalorder %s1461_s27, 0 }
  0x21   : > { %s1893_s30 = smov (%p45_p5, %s44_s30), 0  ;;  %s1895_s11 = smov (!%p45_p5, %s47_s11), %s1457_s26 }
  0x22   : > { %1860 = sst [smem:[#allocation20_spill]] %s1893_s30  ;;  %s119_s13 = ssub.s32 %s1453_s25, %s1893_s30 }
  0x23   : > { %p1601_p8 = por %p130_p7, %p129_p6  ;;  %p49_p9 = scmp.ge.s32.totalorder %s1895_s11, 2 }
  0x24   : > { %p120_p10 = scmp.eq.s32.totalorder %s119_s13, 0  ;;  %p135_p11 = scmp.ne.s32.totalorder %s1437_s21, %s1433_s20 }
  0x25   : > { %p136_p12 = scmp.eq.s32.totalorder %s1034_s28, 0  ;;  %s1897_s11 = smov (%p49_p9, %s1895_s11), 0 }
  0x26   : > { %1862 = sst [smem:[#allocation21_spill]] %s1897_s11  ;;  %s265_s17 = ssub.s32 %s1457_s26, %s1897_s11 }
  0x27   : > { %s1609_s15 = scalar_select %p120_p10, %s1441_s22, %s122_s12  }
  0x28   : > { %p1611_p13 = por %p136_p12, %p135_p11  ;;  %p266_p0 = scmp.eq.s32.totalorder %s265_s17, 0 }
  0x29   : > { %1863 = sst [smem:[#allocation22_spill]] %s1609_s15  ;;  %s268_s30 = sadd.s32 1, %s1429_s19 }
  0x2a   : > { %p278_p1 = scmp.ne.s32.totalorder %s1429_s19, %s1425_s18  ;;  %p279_p2 = scmp.eq.s32.totalorder %s1034_s28, 9 }
  0x2b   : > { %s1621_s13 = scalar_select %p266_p0, %s1429_s19, %s268_s30  }
  0x2c   : > { %p1623_p3 = por %p279_p2, %p278_p1  ;;  %p284_p4 = scmp.ne.s32.totalorder %s1425_s18, %s1421_s0 }
  0x2d   : > { %1865 = sst [smem:[#allocation23_spill]] %s1621_s13  ;;  %p285_p5 = scmp.eq.s32.totalorder %s1035_s29, 9 }
  0x2e   : > { %s1866_s20 = scalar_select %p1623_p3, 1, 0 }
  0x2f   : > { %p1141_p6 = scmp.lt.s32.totalorder %s1461_s27, 10  ;;  %s1631_s12 = sand.u32 1, %s1441_s22  }
  0x30   : > { %1867 = sst [smem:[#allocation24_spill]] %s1866_s20  ;;  %p1633_p7 = por %p285_p5, %p284_p4 }
  0x31   : > { %s1038_s17 = sshll.u32 %s1631_s12, 5  ;;  %s1075_s26 = sshll.u32 %s1453_s25, 9 }
  0x32   : > { %s1868_s11 = scalar_select %p1633_p7, 1, 0 }
  0x33   : > { %s1870_s4 = sld [smem:[#allocation26_spill]]  ;;  %s330_s13 = scalar_lea.vmem [#allocation6], %s1038_s17 }
  0x34   : > { %1869 = sst [smem:[#allocation25_spill]] %s1868_s11  ;;  %s337_s19 = sshll.u32 %s330_s13, 4  ;;  %s338_s19 = int_to_ptr.vmem [resolvable:$true] %s337_s19 }
  0x35   : > { %p1644_p9 = pnand %p1141_p6, %p1601_p8  ;;  %s327_s22 = scalar_lea.sflag [#allocation7], %s1631_s12 }
  0x36   : > { %s1292_s11 = scalar_lea.vmem %s338_s19, 512 }
  0x37   : > { %p1281_p10 = pneg %p1644_p9  ;;  %p1293_p11 = scmp.ne.s32.totalorder %s338_s19, %s1292_s11 }
  0x39   : > { %s336_s15 = scalar_lea.hbm %s1870_s4, %s1075_s26  ;;  %p1295_p12 = pnand %p1293_p11, %p1281_p10 }
  0x3a   : > { %s1464_s26 = smov [#allocation6]  }
  0x3b   : > { %p1296_p0 = pneg %p1295_p12  ;;  %s1297_s17 = sshll.u32 %s1464_s26, 4  ;;  %s1298_s17 = int_to_ptr.vmem [resolvable:$false] %s1297_s17 }
  0x3c   : > { %s1299_s14 = scalar_lea.vmem %s1298_s17, 1024  ;;  %p1300_p8 = scmp.lt.s32.totalorder %s338_s19, %s1298_s17 }
  0x3d   : > { %p1301_p1 = scmp.lt.s32.totalorder %s1299_s14, %s1292_s11 }
  0x3f   : > { %p1302_p2 = por %p1301_p1, %p1300_p8 }
  0x41   : > { %p1303_p4 = pnand %p1302_p2, %p1296_p0 }
  0x43   : > { %1306 = shalt.err (!%p1303_p4)
}
  0x44   : > { %s1465_s13 = smov 64   ;;  %s1466_s28 = smov 4  }
  0x45   : > { %1133 = dma.hbm_to_vmem [thread:$0]  (!%p1644_p9), %s336_s15, 512, %s338_s19, %s327_s22, %s1465_s13, %s1465_s13, %s1466_s28  }
  0x46   : > { %p1044_p5 = scmp.ge.s32.totalorder %s1461_s27, 1  ;;  %p378_p6 = scmp.lt.s32.totalorder %s1461_s27, 11 }
  0x47   : > { %s1041_s11 = sshll.u32 %s1631_s12, 4  ;;  %s1076_s26 = sshll.u32 %s1453_s25, 8 }
  0x48   : > { %p1662_p11 = pnand %p1044_p5, %p378_p6  ;;  %s357_s17 = scalar_lea.vmem [#allocation9], %s1041_s11 }
  0x49   : > { %s364_s14 = sshll.u32 %s357_s17, 4  ;;  %s363_s10 = scalar_lea.hbm %s1838_s6, %s1076_s26  ;;  %s365_s14 = int_to_ptr.vmem [resolvable:$true] %s364_s14 }
  0x4a   : > { %s354_s20 = scalar_lea.sflag [#allocation10], %s1631_s12  ;;  %s1320_s9 = scalar_lea.vmem %s365_s14, 256 }
  0x4b   : > { %p1321_p12 = scmp.ne.s32.totalorder %s365_s14, %s1320_s9  ;;  %s1467_s19 = smov [#allocation9]  }
  0x4c   : > { %s1325_s22 = sshll.u32 %s1467_s19, 4  ;;  %s1326_s22 = int_to_ptr.vmem [resolvable:$false] %s1325_s22 }
  0x4d   : > { %p1323_p0 = pnand %p1321_p12, %p1281_p10  ;;  %s1327_s15 = scalar_lea.vmem %s1326_s22, 512 }
  0x4e   : > { %p1328_p1 = scmp.lt.s32.totalorder %s365_s14, %s1326_s22  ;;  %p1329_p2 = scmp.lt.s32.totalorder %s1327_s15, %s1320_s9 }
  0x4f   : > { %p1324_p8 = pneg %p1323_p0 }
  0x50   : > { %p1330_p4 = por %p1329_p2, %p1328_p1 }
  0x52   : > { %p1331_p5 = pnand %p1330_p4, %p1324_p8 }
  0x54   : > { %1334 = shalt.err (!%p1331_p5)
}
  0x55   : > { %1136 = dma.hbm_to_vmem [thread:$0]  (!%p1644_p9), %s363_s10, 256, %s365_s14, %s354_s20, %s1465_s13, %s1465_s13, %s1466_s28  }
  0x56   : > { %382 = sbr.rel (%p1662_p11) target bundleno = 1379 (0x563), region = 56  ;;  %s384_s4 = sand.u32 (!%p1662_p11), 1, %s1437_s21  }
  0x57   : > { %s1045_s0 = sshll.u32 (!%p1662_p11), %s384_s4, 5  ;;  %s385_s12 = scalar_lea.sflag (!%p1662_p11), [#allocation7], %s384_s4 }
  0x58   : > { %s1682_s11 = scalar_lea.vmem (!%p1662_p11), [#allocation6], %s1045_s0 }
  0x5b   : > { %1408 = dma.done.wait (%p1611_p13), %s385_s12, 512  }
  0x5c   : > { %1410 = vsyncadd (%p1611_p13), %s385_s12, 4294966784  ;;  %s1046_s9 = sshll.u32 %s384_s4, 4  ;;  %s394_s29 = scalar_lea.sflag [#allocation10], %s384_s4 }
  0x5d   : > { %s1688_s26 = scalar_lea.vmem [#allocation9], %s1046_s9 }
  0x5e   : > { %1412 = dma.done.wait (%p1611_p13), %s394_s29, 256  }
  0x5f   : > { %1414 = vsyncadd (%p1611_p13), %s394_s29, 4294967040  ;;  %s445_s10 = sand.u32 1, %s1425_s18   ;;  %s1048_s20 = sshll.u32 %s1449_s24, 1 }
  0x60   : > { %s1698_s13 = sshll.u32 %s445_s10, 3  ;;  %p449_p9 = scmp.lt.s32.totalorder %s1048_s20, 3 }
  0x61   : > { %p454_p10 = scmp.lt.s32.totalorder %s1445_s23, 4  ;;  %s447_s9 = scalar_lea.vmem [#allocation11], %s1698_s13 }
  0x62   : > { %s1899_s20 = smov (!%p449_p9, %s1048_s20), 3  ;;  %p1050_p13 = scmp.ne.s32.totalorder %s1445_s23, 0 }
  0x63   : > { %s1702_s28 = scalar_select %p454_p10, %s1445_s23, 4 }
  0x64   : > { %s1049_s16 = sshll.u32 %s1899_s20, 3  ;;  %464 = sbr.rel (%p1050_p13) target bundleno = 310 (0x136), region = 68 }
  0x65   : > { %s452_s14 = scalar_lea.vmem %s1833_s1, %s1049_s16  ;;  %s456_s15 = scalar_lea.vmem %s1837_s5, %s1702_s28 }
  0x66   : > { %s459_s12 = scalar_lea.vmem %s1839_s7, %s1702_s28 }
  0x69   : > { %vm489_vm0 = vcmask 1045504   ;;  %v1468_v0 = vmov 0.0   ;;  %v1242_v1 = vld [vmem:[%s1834_s2] sm:$0x3f]   ;;  %v469_v3 = vld [vmem:[%s452_s14 + $0x8] sm:$0xff]  ;;  %vm1469_vm1 = vmmov 0  }
  0x6a   : > { %1090 = vmatprep.subr.bf16.mxu0 %v1468_v0  ;;  %v468_v2 = vld [vmem:[%s452_s14] sm:$0xff]  ;;  %1092 = vmatprep.mubr.msk.bf16.mxu0 %vm1469_vm1, %v1468_v0  ;;  %vm465_vm2 = vcmask 261120   ;;  %v491_v4 = vsel %vm489_vm0, %v1242_v1, 0  ;;  %vm485_vm3 = vcmask 97280  }
  0x6b   : > { %v470_v5 = vpack.c.bf16 %v469_v3, %v468_v2  ;;  %466 = vst.msk [vmem:[#allocation3] sm:$0xff] %vm465_vm2, %v1468_v0  ;;  %467 = vst.msk [vmem:[#allocation3 + $0x8] sm:$0xff] %vm465_vm2, %v1468_v0  ;;  %1091 = vmatpush3.bf16.msra.mxu0 %v491_v4  ;;  %v1051_v6 = vld [vmem:[%s1835_s3] ss:$0 sm:$0xff] }
  0x6c   : > { %536 = vst.msk [vmem:[#allocation2] sm:$0xff] %vm465_vm2, %v1468_v0  ;;  %537 = vst.msk [vmem:[#allocation2 + $0x8] sm:$0xff] %vm465_vm2, %v1468_v0 }
  0x6e   : > { %1093 = vmatmul.mubr.msk.bf16.vlgmr.msra.gmra.mxu0 %vm485_vm3, %v470_v5 }
 0x12e   : > { %v527_v7 = vpop.f32.mrf.mxu0 }
 0x12f   : > { %v528_v8 = vadd.f32 %v1051_v6, %v527_v7 }
 0x130   : > { %v1094_v9 = vpop.f32.mrf.mxu0 }
 0x131   : > { %534 = vst.msk [vmem:[#allocation3 + $0x10] sm:$0xff] %vm465_vm2, %v528_v8 }
 0x132   : > { %v530_v10 = vpop.f32.mrf.mxu0 }
 0x133   : > { %v531_v11 = vadd.f32 %v1051_v6, %v530_v10 }
 0x134   : > { %v1095_v12 = vpop.f32.mrf.mxu0 }
 0x135   : > { %535 = vst.msk [vmem:[#allocation3 + $0x18] sm:$0xff] %vm465_vm2, %v531_v11 }
 0x136 PF: > { %v1470_v16 = vmov 0.0   ;;  %v1243_v17 = vld [vmem:[%s1682_s11 + $0x18] sm:$0xff]   ;;  %s1471_s17 = smov 32   ;;  %v1244_v18 = vld [vmem:[%s1682_s11 + $0x10] sm:$0xff]   ;;  %vm1472_vm4 = vmmov 0   ;;  %v1245_v19 = vld [vmem:[%s1682_s11 + $0x8] sm:$0xff]   ;;  %v541_v21 = vlaneseq }
 0x137   : > { %1096 = vmatprep.subr.bf16.mxu0 %v1470_v16  ;;  %1108 = vmatprep.subr.bf16.mxu1 %v1470_v16  ;;  %v1246_v20 = vld [vmem:[%s1682_s11] sm:$0xff]   ;;  %s538_s14 = sld [smem:[#allocation5 + %s1445_s23]]  ;;  %vm594_vm7 = vcmask 261120   ;;  %vm630_vm8 = vcmask 523264   ;;  %v1054_v34 = vld [vmem:[%s456_s15] ss:$0 sm:$0xff] }
 0x138   : > { %v1729_v13 = vld [vmem:[#allocation3 + $0x10] sm:$0xff]  ;;  %1097 = vmatpush3.bf16.msra.mxu0 %v1243_v17  ;;  %1104 = vmatprep.mubr.msk.bf16.mxu0 %vm1472_vm4, %v1470_v16  ;;  %v542_v22 = vshrl.u32 %v541_v21, 7  ;;  %v1247_v45 = vld [vmem:[%s1688_s26 + $0x8] sm:$0xff]   ;;  %s1473_s15 = smov 96   ;;  %p1066_p6 = scmp.ne.s32.totalorder %s1445_s23, 4 }
 0x139   : > { %1098 = vmatprep.subr.bf16.mxu0 %v1470_v16  ;;  %1112 = vmatprep.mubr.msk.bf16.mxu1 %vm1472_vm4, %v1470_v16  ;;  %v1248_v48 = vld [vmem:[%s1688_s26] sm:$0xff]   ;;  %v773_v6 = vld [vmem:[#allocation2 + $0x8] sm:$0xff]  ;;  %s1873_s30 = sld [smem:[#allocation27_spill]] (!%p1066_p6) }
 0x13a   : > { %v543_v23 = vadd.s32 8, %v542_v22  ;;  %v548_v24 = vand.u32 15, %v542_v22  ;;  %1109 = vmatpush3.bf16.msra.mxu1 %v1247_v45  ;;  %v1062_v58 = vld [vmem:[%s459_s12] ss:$0 sm:$0xff] }
 0x13b   : > { %1110 = vmatprep.subr.bf16.mxu1 %v1470_v16  ;;  %v772_v3 = vld [vmem:[#allocation2] sm:$0xff] }
 0x13c   : > { %v1731_v14 = vld [vmem:[#allocation3 + $0x18] sm:$0xff]  ;;  %1099 = vmatpush3.bf16.msra.mxu0 %v1244_v18  ;;  %v555_v25 = vand.u32 15, %v543_v23 }
 0x13d   : > { %v582_v15 = vpack.c.bf16 %v1731_v14, %v1729_v13  ;;  %1100 = vmatprep.subr.bf16.mxu0 %v1470_v16  ;;  %s568_s19 = ssub.s32 16, %s538_s14  ;;  %v572_v26 = vstv %s538_s14 }
 0x13e   : > { %s569_s22 = scalar_lea.vmem [#allocation3], %s568_s19  ;;  %vm573_vm5 = vcmp.lt.s32.totalorder %v548_v24, %v572_v26  ;;  %vm574_vm6 = vcmp.lt.s32.totalorder %v555_v25, %v572_v26  ;;  %1111 = vmatpush3.bf16.msra.mxu1 %v1248_v48 }
 0x13f   : > { %592 = vrot.lane.b32.xlu0 %v582_v15, %s1471_s17  ;;  %v570_v27 = vld [vmem:[%s569_s22] sm:$0xff]  ;;  %v571_v28 = vld [vmem:[%s569_s22 + $0x8] sm:$0xff] }
 0x140   : > { %1101 = vmatpush3.bf16.msra.mxu0 %v1245_v19  ;;  %v579_v29 = vsel %vm573_vm5, 0.0, %v570_v27  ;;  %v580_v30 = vsel %vm574_vm6, 0.0, %v571_v28 }
 0x141   : > { %1102 = vmatprep.subr.bf16.mxu0 %v1470_v16  ;;  %v581_v31 = vpack.c.bf16 %v580_v30, %v579_v29 }
 0x144   : > { %1103 = vmatpush3.bf16.msra.mxu0 %v1246_v20 }
 0x1b1   : > { %v593_v32 = vpop.permute.xlu0 %592 }
 0x1b2   : > { %v597_v33 = vsel %vm594_vm7, %v581_v31, %v593_v32 }
 0x1b3   : > { %1105 = vmatmul.mubr.msk.bf16.vlgmr.msra.gmra.mxu0 %vm630_vm8, %v597_v33 }
 0x273   : > { %v667_v35 = vpop.f32.mrf.mxu0 }
 0x274   : > { %v674_v36 = vadd.f32 %v1054_v34, %v667_v35 }
 0x275   : > { %v1106_v37 = vpop.f32.mrf.mxu0 }
 0x276   : > { %v1060_v38 = vmul.f32 -1.442695, %v674_v36 }
 0x277   : > { %v670_v39 = vpop.f32.mrf.mxu0 }
 0x278   : > { %1249 = vpow2.f32 %v1060_v38  ;;  %v675_v40 = vadd.f32 %v1054_v34, %v670_v39 }
 0x279   : > { %v1107_v41 = vpop.f32.mrf.mxu0 }
 0x27a   : > { %v1061_v42 = vmul.f32 -1.442695, %v675_v40 }
 0x27c   : > { %1251 = vpow2.f32 %v1061_v42 }
 0x285   : > { %v1250_v43 = vpop.eup %1249 }
 0x286   : > { %v684_v44 = vadd.f32 1.0, %v1250_v43 }
 0x288   : > { %1253 = vrcp.f32 %v684_v44 }
 0x289   : > { %v1252_v46 = vpop.eup %1251 }
 0x28a   : > { %v685_v47 = vadd.f32 1.0, %v1252_v46 }
 0x28c   : > { %1255 = vrcp.f32 %v685_v47 }
 0x28d   : > { %1257 = vtanh.f32 %v674_v36 }
 0x28e   : > { %1259 = vtanh.f32 %v675_v40 }
 0x295   : > { %v1254_v49 = vpop.eup %1253 }
 0x296   : > { %692 = vrot.lane.b32.xlu0 %v1254_v49, %s1473_s15 }
 0x299   : > { %v1256_v50 = vpop.eup %1255 }
 0x29a   : > { %694 = vrot.lane.b32.xlu1 %v1256_v50, %s1473_s15  ;;  %v1258_v52 = vpop.eup %1257 }
 0x29b   : > { %v1260_v53 = vpop.eup %1259 }
 0x308   : > { %v693_v51 = vpop.permute.xlu0 %692 }
 0x309   : > { %v698_v55 = vmul.f32 %v1258_v52, %v693_v51 }
 0x30c   : > { %v695_v54 = vpop.permute.xlu1 %694 }
 0x30d   : > { %v699_v56 = vmul.f32 %v1260_v53, %v695_v54 }
 0x30f   : > { %v700_v57 = vpack.c.bf16 %v699_v56, %v698_v55 }
 0x311   : > { %1113 = vmatmul.mubr.msk.bf16.vlgmr.msra.gmra.mxu1 %vm594_vm7, %v700_v57 }
 0x3d1   : > { %v761_v59 = vpop.f32.mrf.mxu1 }
 0x3d2   : > { %v762_v60 = vadd.f32 %v1062_v58, %v761_v59 }
 0x3d3   : > { %v1114_v61 = vpop.f32.mrf.mxu1 }
 0x3d4   : > { %v768_v62 = vadd.f32 %v762_v60, %v1729_v13  ;;  %776 = vrot.lane.b32.xlu1 %v762_v60, %s1473_s15 }
 0x3d5   : > { %v764_v63 = vpop.f32.mrf.mxu1 }
 0x3d6   : > { %770 = vst.msk [vmem:[#allocation3 + $0x10] sm:$0xff] %vm594_vm7, %v768_v62  ;;  %v765_v0 = vadd.f32 %v1062_v58, %v764_v63 }
 0x3d7   : > { %v1115_v1 = vpop.f32.mrf.mxu1 }
 0x3d8   : > { %v769_v2 = vadd.f32 %v765_v0, %v1731_v14  ;;  %778 = vrot.lane.b32.xlu0 %v765_v0, %s1473_s15 }
 0x3da   : > { %771 = vst.msk [vmem:[#allocation3 + $0x18] sm:$0xff] %vm594_vm7, %v769_v2 }
 0x446   : > { %v777_v4 = vpop.permute.xlu1 %776 }
 0x447   : > { %v782_v5 = vadd.f32 %v777_v4, %v772_v3 }
 0x449   : > { %784 = vst.msk [vmem:[#allocation2] sm:$0xff] %vm594_vm7, %v782_v5  ;;  %789 = sbr.rel (%p1066_p6) target bundleno = 1356 (0x54c), region = 72 }
 0x44a   : > { %v779_v7 = vpop.permute.xlu0 %778 }
 0x44b   : > { %v783_v8 = vadd.f32 %v779_v7, %v773_v6 }
 0x44d   : > { %785 = vst.msk [vmem:[#allocation2 + $0x8] sm:$0xff] %vm594_vm7, %v783_v8 }
 0x44e   : > { %v1261_v9 = vld [vmem:[%s1840_s8 + $0x8] sm:$0xff]   ;;  %v1474_v10 = vmov 0.0   ;;  %v1262_v11 = vld [vmem:[%s1840_s8] sm:$0xff]   ;;  %vm1475_vm9 = vmmov 0   ;;  %v860_v30 = vand.u32 127, %v541_v21 }
 0x44f   : > { %1116 = vmatprep.subr.bf16.mxu0 %v1474_v10  ;;  %1120 = vmatprep.mubr.msk.bf16.mxu0 %vm1475_vm9, %v1474_v10  ;;  %v1067_v17 = vld [vmem:[%s1873_s30] ss:$0 sm:$0xff] }
 0x450   : > { %1117 = vmatpush3.bf16.msra.mxu0 %v1261_v9  ;;  %v790_v12 = vld [vmem:[#allocation2] sm:$0xff]  ;;  %vm861_vm11 = vcmp.ge.s32.totalorder %v860_v30, 2  ;;  %vm862_vm12 = vcmp.lt.s32.totalorder %v860_v30, 4 }
 0x451   : > { %1118 = vmatprep.subr.bf16.mxu0 %v1474_v10  ;;  %vm863_vm14 = vmand %vm861_vm11, %vm862_vm12 }
 0x454   : > { %v791_v13 = vld [vmem:[#allocation2 + $0x8] sm:$0xff]  ;;  %1119 = vmatpush3.bf16.msra.mxu0 %v1262_v11 }
 0x455   : > { %v792_v14 = vpack.c.bf16 %v791_v13, %v790_v12 }
 0x457   : > { %1121 = vmatmul.mubr.msk.bf16.vlgmr.msra.gmra.mxu0 %vm594_vm7, %v792_v14 }
 0x517   : > { %v853_v15 = vpop.f32.mrf.mxu0 }
 0x519   : > { %v1122_v16 = vpop.f32.mrf.mxu0 }
 0x51b   : > { %v855_v18 = vpop.f32.mrf.mxu0 }
 0x51c   : > { %v856_v19 = vadd.f32 %v1067_v17, %v855_v18 }
 0x51d   : > { %v1123_v20 = vpop.f32.mrf.mxu0 }
 0x51e   : > { %v867_v22 = vand.u32 2147483647, %v856_v19  ;;  %v864_v34 = vmax.f32 %v856_v19, 0.0  ;;  %vm865_vm13 = vcmp.ne.f32.partialorder %v856_v19, %v856_v19 }
 0x520   : > { %v868_v23 = vsub.f32 0.0, %v867_v22 }
 0x522   : > { %v869_v24 = vmul.f32 1.442695, %v868_v23 }
 0x524   : > { %1263 = vpow2.f32 %v869_v24 }
 0x531   : > { %v1264_v25 = vpop.eup %1263 }
 0x532   : > { %v871_v26 = vadd.f32 1.0, %v1264_v25  ;;  %v874_v27 = vmul.f32 -0.5, %v1264_v25  ;;  %v877_v29 = vand.u32 2147483647, %v1264_v25 }
 0x534   : > { %1265 = vlog2.f32 %v871_v26  ;;  %v875_v28 = vadd.f32 1.0, %v874_v27  ;;  %vm878_vm10 = vcmp.lt.f32.partialorder %v877_v29, 0.0004427343 }
 0x536   : > { %v876_v33 = vmul.f32 %v1264_v25, %v875_v28 }
 0x541   : > { %v1266_v31 = vpop.eup %1265 }
 0x542   : > { %v873_v32 = vmul.f32 0.6931472, %v1266_v31 }
 0x544   : > { %v879_v35 = vsel %vm878_vm10, %v876_v33, %v873_v32 }
 0x545   : > { %v880_v36 = vadd.f32 %v879_v35, %v864_v34 }
 0x547   : > { %v881_v37 = vsel %vm865_vm13, %v856_v19, %v880_v36 }
 0x548   : > { %v882_v38 = vadd.f32 1e-06, %v881_v37 }
 0x54a   : > { %v883_v39 = vsel %vm863_vm14, %v882_v38, %v856_v19 }
 0x54b   : > { %884 = vst [vmem:[%s447_s9] sm:$0xff] %v883_v39 }
 0x54c PF: > { %s1072_s14 = sshll.u32 %s1449_s24, 7  ;;  %s1875_s11 = sld [smem:[#allocation28_spill]] }
 0x54d   : > { %s899_s15 = sshll.u32 %s447_s9, 4  ;;  %s886_s0 = scalar_lea.sflag [#allocation8], %s445_s10  ;;  %s900_s15 = int_to_ptr.vmem [resolvable:$true] %s899_s15 }
 0x54e   : > { %s1335_s26 = scalar_lea.vmem %s900_s15, 128  ;;  %s1476_s28 = smov [#allocation11]  }
 0x54f   : > { %p1336_p11 = scmp.ne.s32.totalorder %s900_s15, %s1335_s26  ;;  %s1339_s12 = sshll.u32 %s1476_s28, 4  ;;  %s1340_s12 = int_to_ptr.vmem [resolvable:$false] %s1339_s12 }
 0x550   : > { %s1341_s29 = scalar_lea.vmem %s1340_s12, 256  ;;  %p1342_p8 = scmp.lt.s32.totalorder %s900_s15, %s1340_s12 }
 0x551   : > { %p1337_p12 = pnand %p1336_p11, %p1623_p3  ;;  %p1343_p1 = scmp.lt.s32.totalorder %s1341_s29, %s1335_s26 }
 0x552   : > { %s897_s4 = scalar_lea.hbm %s1875_s11, %s1072_s14 }
 0x553   : > { %p1338_p0 = pneg %p1337_p12  ;;  %p1344_p2 = por %p1343_p1, %p1342_p8 }
 0x555   : > { %p1345_p4 = pnand %p1344_p2, %p1338_p0 }
 0x557   : > { %1348 = shalt.err (!%p1345_p4)
}
 0x558   : > { %s1349_s24 = scalar_lea.hbm %s897_s4, 128  ;;  %s1353_s9 = scalar_lea.hbm %s1875_s11, 256 }
 0x559   : > { %p1350_p5 = scmp.ne.s32.totalorder %s897_s4, %s1349_s24  ;;  %p1354_p13 = scmp.lt.s32.totalorder %s897_s4, %s1875_s11 }
 0x55a   : > { %p1355_p6 = scmp.lt.s32.totalorder %s1353_s9, %s1349_s24 }
 0x55b   : > { %p1351_p9 = pnand %p1350_p5, %p1623_p3 }
 0x55c   : > { %p1356_p11 = por %p1355_p6, %p1354_p13 }
 0x55d   : > { %p1352_p10 = pneg %p1351_p9 }
 0x55f   : > { %p1357_p12 = pnand %p1356_p11, %p1352_p10 }
 0x561   : > { %1360 = shalt.err (!%p1357_p12)
}
 0x562   : > { %1128 = dma.vmem_to_hbm [thread:$0]  (%p1623_p3), %s900_s15, 128, %s897_s4, %s886_s0  }
 0x563 PF: > { %s1876_s16 = sld [smem:[#allocation16_spill]]  ;;  %p1142_p0 = scmp.ge.s32.totalorder %s1461_s27, 2 }
 0x565   : > { %p1138_p8 = pnand %p1142_p0, %p1633_p7 }
 0x567   : > { %p1139_p1 = pneg %p1138_p8 }
 0x569   : > { %s911_s14 = sand.u32 1, %s1876_s16  }
 0x56a   : > { %s912_s19 = scalar_lea.sflag [#allocation8], %s911_s14 }
 0x56b   : > { %1416 = dma.done.wait (%p1139_p1), %s912_s19, 128  }
 0x56c   : > { %1418 = vsyncadd (%p1139_p1), %s912_s19, 4294967168  ;;  %s35_s27 = sadd.s32 1, %s1461_s27   ;;  %s1878_s22 = sld [smem:[#allocation17_spill]] }
 0x56d   : > { %p32_p2 = scmp.ge.s32.totalorder %s35_s27, 12   ;;  %s1879_s19 = sld [smem:[#allocation23_spill]] }
 0x56e   : > { %s1880_s17 = sld [smem:[#allocation18_spill]]  ;;  %s1885_s0 = smov %s1425_s18 }
 0x56f   : > { %s1881_s4 = sld [smem:[#allocation22_spill]]  ;;  %s1887_s20 = smov %s1437_s21 }
 0x570   : > { %s1882_s24 = sld [smem:[#allocation19_spill]]  ;;  %s1890_s23 = smov %s1453_s25 }
 0x571   : > { %s1883_s15 = sld [smem:[#allocation20_spill]] }
 0x572   : > { %s1884_s26 = sld [smem:[#allocation21_spill]]  ;;  %s1886_s18 = smov %s1878_s22 }
 0x573   :  { %34 = sbr.rel (!%p32_p2) target bundleno = 27 (0x1b), region = 132 }
 0x574   : > { %s1888_s21 = smov %s1880_s17 }
 0x575   : > { %s1889_s22 = smov %s1881_s4 }
 0x577   : > { %s1891_s25 = smov %s1883_s15 }
 0x578   :  { %917 = vsyncpa [#allocation7], 1 }
 0x579   :  { %919 = vsyncpa [#allocation7 + $0x1], 1 }
 0x57a   :  { %920 = vsyncpa [#allocation10], 1 }
 0x57b   :  { %922 = vsyncpa [#allocation10 + $0x1], 1 }
 0x57c   :  { %923 = vsyncpa [#allocation8], 1 }
 0x57d   :  { %925 = vsyncpa [#allocation8 + $0x1], 1 }

</bundles_post_ra>
